<compile_context>
chip_gen: v7x
topology: tpu7x:2x2x1
jax: 0.10.0
libtpu: 0.0.40
codegen_flags: <defaults>
</compile_context>

<pallas_src>
import functools

import jax
import jax.numpy as jnp
from jax.experimental import pallas as pl
from jax.experimental.pallas import tpu as pltpu


def _dcgan_fc_kernel(x_ref, w_ref, b_ref, o_ref):
    # x_ref: (tm, nin), w_ref: (nin, tn), b_ref: (1, tn), o_ref: (tm, tn)
    y = jnp.dot(x_ref[...], w_ref[...], preferred_element_type=jnp.float32)
    y = y + b_ref[...].astype(jnp.float32)      # bias broadcast over rows (f32)
    y = jnp.maximum(y, 0.2 * y)                  # LeakyReLU(0.2): mul + max
    o_ref[...] = y.astype(o_ref.dtype)


def _round_up(x, m):
    return ((x + m - 1) // m) * m


# Conservative budget for the double-buffered per-step working set: fits the
# v7x 32 MiB scoped default (64 MiB physical) and is far under v5e/v6e 128 MiB.
_VMEM_BUDGET_BYTES = 24 * 1024 * 1024


def _block_bytes(tm, tn, nin, itemsize):
    # x tile + weight tile + bias tile + output tile, double-buffered.
    return 2 * (tm * nin + nin * tn + tn + tm * tn) * itemsize


@functools.lru_cache(maxsize=1)
def _tensorcores_per_chip():
    try:
        kind = jax.devices()[0].device_kind.lower()
        if "v7" in kind:
            return 2
    except Exception:
        pass
    return 1


def _choose_tiling(b_pad8, nin, nout, itemsize):
    """Returns (tm, tn). Preference order:
      1. single block (tm = b_pad8, tn = nout) if it fits the VMEM budget
         (on v7x, large batches split into exactly 2 parallel row tiles),
      2. row-tile only, keeping W/bias resident and stores lane-dense,
      3. only tile nout when even a 256-row tile with full nout overflows.
    """
    if _block_bytes(b_pad8, nout, nin, itemsize) <= _VMEM_BUDGET_BYTES:
        if _tensorcores_per_chip() == 2 and b_pad8 >= 512:
            # Exactly 2 parallel row tiles -> one per TensorCore, ~zero padding.
            return _round_up(pl.cdiv(b_pad8, 2), 8), nout
        return b_pad8, nout
    for tm in (1024, 512, 256, 128, 64, 32, 16, 8):
        if tm < b_pad8 and _block_bytes(tm, nout, nin, itemsize) <= _VMEM_BUDGET_BYTES:
            return tm, nout
    for tn in (512, 256, 128):
        if nout % tn == 0 and _block_bytes(256, tn, nin, itemsize) <= _VMEM_BUDGET_BYTES:
            return min(256, b_pad8), tn
    return min(256, b_pad8), min(128, nout)


def _dcgan_fc_forward_impl(x, w_t, b):
    """x: (B, nin); w_t: (nin, nout) = PyTorch Linear weight transposed;
    b: (nout,). Returns (B, nout) = LeakyReLU(x @ w_t + b, 0.2)."""
    B, nin = x.shape
    nin_w, nout = w_t.shape
    assert nin == nin_w
    assert b.shape == (nout,)
    itemsize = jnp.dtype(x.dtype).itemsize

    # Pad only to the 8-sublane multiple (no tile-multiple round trip).
    b_pad8 = _round_up(max(B, 8), 8)
    if b_pad8 != B:
        x = jnp.pad(x, ((0, b_pad8 - B), (0, 0)))

    tm, tn = _choose_tiling(b_pad8, nin, nout, itemsize)
    b2 = b.reshape(1, nout)

    # Advisory only; computed from the true B (not padded rows).
    cost = pl.CostEstimate(
        flops=2 * B * nin * nout,
        transcendentals=0,
        bytes_accessed=(B * nin + nin * nout + nout + B * nout) * itemsize,
    )

    # K (nin) is kept resident on purpose: at DCGAN sizes the kernel is
    # latency/DMA bound, so fewer, larger blocks beat any K-axis pipelining.
    if tn == nout:
        # 1-D grid over row tiles; W/bias block index is constant so Pallas
        # keeps them resident after step 0. Ragged last tile (if any) is
        # handled by Pallas' masked edge-block loads/stores.
        grid = (pl.cdiv(b_pad8, tm),)
        in_specs = [
            pl.BlockSpec((tm, nin), lambda i: (i, 0)),
            pl.BlockSpec((nin, tn), lambda i: (0, 0)),
            pl.BlockSpec((1, tn), lambda i: (0, 0)),
        ]
        out_spec = pl.BlockSpec((tm, tn), lambda i: (i, 0))
        dim_sem = ("parallel",)
    else:
        grid = (pl.cdiv(b_pad8, tm), pl.cdiv(nout, tn))
        in_specs = [
            pl.BlockSpec((tm, nin), lambda i, j: (i, 0)),
            pl.BlockSpec((nin, tn), lambda i, j: (0, j)),
            pl.BlockSpec((1, tn), lambda i, j: (0, j)),
        ]
        out_spec = pl.BlockSpec((tm, tn), lambda i, j: (i, j))
        dim_sem = ("parallel", "parallel")

    out = pl.pallas_call(
        _dcgan_fc_kernel,
        out_shape=jax.ShapeDtypeStruct((b_pad8, nout), x.dtype),
        grid_spec=pltpu.PrefetchScalarGridSpec(
            num_scalar_prefetch=0,
            grid=grid,
            in_specs=in_specs,
            out_specs=out_spec,
        ),
        compiler_params=pltpu.CompilerParams(dimension_semantics=dim_sem),
        cost_estimate=cost,
    )(x, w_t, b2)

    return out[:B] if b_pad8 != B else out


# One jit for the whole forward so pad / pallas_call / slice are a single
# dispatch (shapes are static at trace time).
dcgan_fc_forward = jax.jit(_dcgan_fc_forward_impl)


def _reference(x, w_t, b):
    y = x @ w_t + b[None, :]
    return jnp.where(y >= 0, y, 0.2 * y)


if __name__ == "__main__":
    nin, nout = 32, 128
    key = jax.random.PRNGKey(0)
    kx1, kx2, kw, kb = jax.random.split(key, 4)

    # nn.Linear-style init: U(-1/sqrt(nin), 1/sqrt(nin)) for weight and bias.
    bound = 1.0 / jnp.sqrt(jnp.float32(nin))
    w_pt = jax.random.uniform(kw, (nout, nin), jnp.float32, -bound, bound)
    b = jax.random.uniform(kb, (nout,), jnp.float32, -bound, bound)
    w_t = w_pt.T  # (nin, nout)

    # Case 1: small batch -> single block, no padding, no grid overhead.
    x1 = jax.random.normal(kx1, (8, nin), jnp.float32)
    out1 = jax.block_until_ready(dcgan_fc_forward(x1, w_t, b))
    ref1 = _reference(x1, w_t, b)
    assert out1.shape == (8, nout)
    assert jnp.allclose(out1, ref1, atol=1e-5, rtol=1e-5)

    # Case 2: larger batch (600 rows, already an 8-multiple -> zero padding);
    # single block on v5e/v6e, two parallel row tiles on v7x.
    x2 = jax.random.normal(kx2, (600, nin), jnp.float32)
    out2 = jax.block_until_ready(dcgan_fc_forward(x2, w_t, b))
    ref2 = _reference(x2, w_t, b)
    assert out2.shape == (600, nout)
    assert jnp.allclose(out2, ref2, atol=1e-5, rtol=1e-5)

    print("KERNEL_OK")
</pallas_src>

<mosaic_0001>
module attributes {stable_mosaic.version = 11 : i64} {
  func.func @_dcgan_fc_kernel(%arg0: i32, %arg1: memref<8x32xf32, #tpu.memory_space<vmem>>, %arg2: memref<32x128xf32, #tpu.memory_space<vmem>>, %arg3: memref<1x128xf32, #tpu.memory_space<vmem>>, %arg4: memref<8x128xf32, #tpu.memory_space<vmem>>) attributes {dimension_semantics = [#tpu.dimension_semantics<parallel>], iteration_bounds = array<i64: 1>, scalar_prefetch = 0 : i64, scratch_operands = 0 : i64, tpu.core_type = #tpu.core_type<tc>, window_params = [{transform_indices = @transform_0, window_bounds = array<i64: 8, 32>}, {pipeline_mode = #tpu.pipeline_mode<synchronous>, transform_indices = @transform_1, window_bounds = array<i64: 32, 128>}, {pipeline_mode = #tpu.pipeline_mode<synchronous>, transform_indices = @transform_2, window_bounds = array<i64: 1, 128>}, {transform_indices = @transform_3, window_bounds = array<i64: 8, 128>}]} {
    %c0 = arith.constant 0 : index
    %c0_0 = arith.constant 0 : index
    %0 = vector.load %arg1[%c0, %c0_0] : memref<8x32xf32, #tpu.memory_space<vmem>>, vector<8x32xf32>
    %c0_1 = arith.constant 0 : index
    %c0_2 = arith.constant 0 : index
    %1 = vector.load %arg2[%c0_1, %c0_2] : memref<32x128xf32, #tpu.memory_space<vmem>>, vector<32x128xf32>
    %cst = arith.constant dense<0.000000e+00> : vector<8x128xf32>
    %2 = tpu.matmul %0, %1, %cst {dimension_numbers = #tpu.dot_dimension_numbers<[1], [0], [0], [1], [0, 0, 1, 1], [], []>} : vector<8x32xf32>, vector<32x128xf32>, vector<8x128xf32> -> vector<8x128xf32>
    %c0_3 = arith.constant 0 : index
    %c0_4 = arith.constant 0 : index
    %3 = vector.load %arg3[%c0_3, %c0_4] : memref<1x128xf32, #tpu.memory_space<vmem>>, vector<1x128xf32>
    %4 = vector.broadcast %3 : vector<1x128xf32> to vector<8x128xf32>
    %5 = arith.addf %2, %4 : vector<8x128xf32>
    %cst_5 = arith.constant 2.000000e-01 : f32
    %6 = vector.broadcast %cst_5 : f32 to vector<8x128xf32>
    %7 = arith.mulf %6, %5 : vector<8x128xf32>
    %8 = arith.maximumf %5, %7 : vector<8x128xf32>
    %c0_6 = arith.constant 0 : index
    %c0_7 = arith.constant 0 : index
    %9 = vector.load %arg4[%c0_6, %c0_7] : memref<8x128xf32, #tpu.memory_space<vmem>>, vector<8x128xf32>
    tpu.vector_store %arg4[%c0_6, %c0_7], %8 {strides = array<i32>} : memref<8x128xf32, #tpu.memory_space<vmem>>, vector<8x128xf32>,
    return
  }
  func.func @transform_0(%arg0: i32) -> (i32, i32) {
    %c0_i32 = arith.constant 0 : i32
    %c0_i32_0 = arith.constant 0 : i32
    return %arg0, %c0_i32 : i32, i32
  }
  func.func @transform_1(%arg0: i32) -> (i32, i32) {
    %c0_i32 = arith.constant 0 : i32
    %c0_i32_0 = arith.constant 0 : i32
    %c0_i32_1 = arith.constant 0 : i32
    return %c0_i32, %c0_i32_0 : i32, i32
  }
  func.func @transform_2(%arg0: i32) -> (i32, i32) {
    %c0_i32 = arith.constant 0 : i32
    %c0_i32_0 = arith.constant 0 : i32
    %c0_i32_1 = arith.constant 0 : i32
    return %c0_i32, %c0_i32_0 : i32, i32
  }
  func.func @transform_3(%arg0: i32) -> (i32, i32) {
    %c0_i32 = arith.constant 0 : i32
    %c0_i32_0 = arith.constant 0 : i32
    return %arg0, %c0_i32 : i32, i32
  }
}

</mosaic_0001>

<bundles_post_ra>
// kernel: _dcgan_fc_forward_impl.1
= control target key start
LH: loop header
LB: loop body
LE: loop exit
PB: predicated region body
PF: predicated region fallthrough
CT: control target
= control target key end

     0   :  { %8 = vsyncpa [#allocation3], 0  ;;  %s324_s0 = inlined_call_operand.hbm [shape: f32[8,32], index: 0, kind: input, shape index: {}]   ;;  %s325_s1 = inlined_call_operand.hbm [shape: f32[32,128], index: 1, kind: input, shape index: {}]   ;;  %s326_s2 = inlined_call_operand.vmem [shape: f32[1,128], index: 2, kind: input, shape index: {}]   ;;  %s327_s3 = inlined_call_operand.hbm [shape: f32[8,128], index: 3, kind: output, shape index: {}]  }
   0x1   :  { %9 = vsyncpa [#allocation6], 0 }
   0x2   :  { %10 = vsyncpa [#allocation4], 0  ;;  %s250_s12 = smov [#allocation2]   ;;  %s251_s14 = smov [#allocation5]  }
   0x3   :  { %s17_s13 = sshll.u32 %s250_s12, 4  ;;  %s26_s15 = sshll.u32 %s251_s14, 4  ;;  %s18_s13 = int_to_ptr.vmem [resolvable:$true] %s17_s13  ;;  %s278_s15 = int_to_ptr.vmem [resolvable:$true] %s26_s15 }
   0x4   :  { %s178_s18 = scalar_lea.hbm %s324_s0, 128 }
   0x5   :  { %p179_p0 = scmp.ne.s32.totalorder %s324_s0, %s178_s18  ;;  %p182_p1 = scmp.lt.u32.totalorder %s178_s18, %s324_s0 }
   0x7   :  { %p184_p2 = pnand %p182_p1, %p179_p0 }
   0x9   :  { %187 = shalt.err (!%p184_p2)
}
   0xa   :  { %s188_s23 = scalar_lea.vmem %s18_s13, 128  ;;  %p193_p4 = scmp.lt.s32.totalorder %s18_s13, %s18_s13 }
   0xb   :  { %p189_p3 = scmp.ne.s32.totalorder %s18_s13, %s188_s23  ;;  %p194_p5 = scmp.lt.s32.totalorder %s188_s23, %s188_s23 }
   0xd   :  { %p195_p6 = por %p194_p5, %p193_p4 }
   0xf   :  { %p196_p7 = pnand %p195_p6, %p189_p3 }
  0x11   :  { %199 = shalt.err (!%p196_p7)
}
  0x12   :  { %20 = dma.hbm_to_vmem [thread:$0]  %s324_s0, 128, %s18_s13, [#allocation3]  }
  0x13   :  { %s200_s28 = scalar_lea.hbm %s325_s1, 512 }
  0x14   :  { %p201_p8 = scmp.ne.s32.totalorder %s325_s1, %s200_s28  ;;  %p204_p9 = scmp.lt.u32.totalorder %s200_s28, %s325_s1 }
  0x16   :  { %p206_p10 = pnand %p204_p9, %p201_p8 }
  0x18   :  { %209 = shalt.err (!%p206_p10)
}
  0x19   :  { %s210_s6 = scalar_lea.vmem %s278_s15, 512  ;;  %p215_p12 = scmp.lt.s32.totalorder %s278_s15, %s278_s15 }
  0x1a   :  { %p211_p11 = scmp.ne.s32.totalorder %s278_s15, %s210_s6  ;;  %p216_p13 = scmp.lt.s32.totalorder %s210_s6, %s210_s6 }
  0x1c   :  { %p217_p0 = por %p216_p13, %p215_p12 }
  0x1e   :  { %p218_p1 = pnand %p217_p0, %p211_p11 }
  0x20   :  { %221 = shalt.err (!%p218_p1)
}
  0x21   :  { %s252_s0 = smov 128   ;;  %s253_s7 = smov 8  }
  0x22   :  { %32 = dma.hbm_to_vmem [thread:$0]  %s325_s1, 512, %s278_s15, [#allocation6], %s252_s0, %s252_s0, %s253_s7  }
  0x23   :  { %244 = dma.done.wait [#allocation3], 128  }
  0x24   :  { %245 = vsyncadd [#allocation3], 4294967168 }
  0x25   :  { %246 = dma.done.wait [#allocation6], 512  }
  0x26   :  { %247 = vsyncadd [#allocation6], 4294966784  ;;  %v254_v0 = vmov 0.0|0.0   ;;  %vm255_vm0 = vmmov 0   ;;  %v256_v1 = vmov 0.0   ;;  %v42_v2 = vld [vmem:[#allocation5] sm:$0xff] }
  0x27   :  { %164 = vmatprep.subr.bf16.mxu0 %v254_v0  ;;  %161 = vmatprep.mubr.msk.f32.mxu0 %vm255_vm0, %v256_v1  ;;  %v43_v3 = vld [vmem:[#allocation5 + $0x8] sm:$0xff]  ;;  %v44_v4 = vld [vmem:[#allocation5 + $0x10] sm:$0xff]  ;;  %v45_v6 = vld [vmem:[#allocation5 + $0x18] sm:$0xff]  ;;  %vm53_vm1 = vcmask 261120   ;;  %s257_s11 = smov [#allocation7]  }
  0x28   :  { %v165_v5 = vpack.c.bf16 %v43_v3, %v42_v2  ;;  %v168_v7 = vpack.c.bf16 %v45_v6, %v44_v4  ;;  %v41_v8 = vld [vmem:[#allocation2] sm:$0xff]  ;;  %s136_s12 = sshll.u32 %s257_s11, 4  ;;  %s137_s12 = int_to_ptr.vmem [resolvable:$true] %s136_s12 }
  0x29   :  { %v146_v9 = vld [vmem:[%s326_s2] ss:$0 sm:$0xff]  ;;  %s222_s13 = scalar_lea.vmem %s137_s12, 128  ;;  %p227_p3 = scmp.lt.s32.totalorder %s137_s12, %s137_s12 }
  0x2a   :  { %166 = vmatpush3.bf16.msra.mxu0 %v165_v5  ;;  %p223_p2 = scmp.ne.s32.totalorder %s137_s12, %s222_s13  ;;  %p228_p4 = scmp.lt.s32.totalorder %s222_s13, %s222_s13 }
  0x2b   :  { %167 = vmatprep.subr.bf16.mxu0 %v254_v0 }
  0x2c   :  { %p229_p5 = por %p228_p4, %p227_p3 }
  0x2e   :  { %169 = vmatpush3.bf16.msra.mxu0 %v168_v7  ;;  %p230_p6 = pnand %p229_p5, %p223_p2 }
  0x31   :  { %162 = vmatmul.mubr.msk.f32.vlgmr.msra.gmra.mrb[0].mxu0 %vm53_vm1, %v41_v8 }
 0x104   :  { %v123_v10 = vpop.f32.mrb[0].mxu0 }
 0x105   :  { %v124_v11 = vadd.f32 %v146_v9, %v123_v10  ;;  %v163_v12 = vpop.f32.mrb[1].mxu0 }
 0x107   :  { %v127_v13 = vmul.f32 0.2, %v124_v11 }
 0x109   :  { %v128_v14 = vmax.f32 %v124_v11, %v127_v13 }
 0x10b   :  { %129 = vst [vmem:[#allocation7] sm:$0xff] %v128_v14 }
 0x10c   :  { %233 = shalt.err (!%p230_p6)
}
 0x10d   :  { %s234_s2 = scalar_lea.hbm %s327_s3, 128 }
 0x10e   :  { %p235_p7 = scmp.ne.s32.totalorder %s327_s3, %s234_s2  ;;  %p238_p8 = scmp.lt.u32.totalorder %s234_s2, %s327_s3 }
 0x110   :  { %p240_p9 = pnand %p238_p8, %p235_p7 }
 0x112   :  { %243 = shalt.err (!%p240_p9)
}
 0x113   :  { %139 = dma.vmem_to_hbm [thread:$0]  %s137_s12, 128, %s327_s3, [#allocation4]  }
 0x114   :  { %248 = dma.done.wait [#allocation4], 128  }
 0x115   :  { %249 = vsyncadd [#allocation4], 4294967168 }
 0x116   :  { %143 = vsyncpa [#allocation3], 1 }
 0x117   :  { %144 = vsyncpa [#allocation6], 1 }
 0x118   :  { %145 = vsyncpa [#allocation4], 1 }

</bundles_post_ra>
